<compile_context>
chip_gen: v7x
topology: tpu7x:2x2x1
jax: 0.10.0
libtpu: 0.0.40
codegen_flags: <defaults>
</compile_context>

<pallas_src>
import math

import jax
import jax.numpy as jnp
from jax.experimental import pallas as pl
from jax.experimental.pallas import tpu as pltpu

LANES = 128
TARGET_BLOCK_BYTES = 8 * 1024 * 1024      # ~8 MiB blocks per grid step
MIN_SPLIT_BLOCK_BYTES = 2 * 1024 * 1024   # never shrink blocks below this for megacore
VMEM_CAP_BYTES = 48 * 1024 * 1024         # stay under v7x's 64 MiB physical VMEM
MAX_DMA_CHUNKS = 8                        # ragged path: parallel DMA engines


def _copy_kernel(x_ref, o_ref):
    # Pure identity copy of the current VMEM tile.
    o_ref[...] = x_ref[...]


def _resolve_view_shape(total, shape):
    """Replicate torch.Tensor.view shape resolution (supports one -1)."""
    shape = list(shape)
    if shape.count(-1) > 1:
        raise ValueError("only one dimension can be inferred")
    if -1 in shape:
        known = 1
        for s in shape:
            if s != -1:
                known *= s
        if known == 0 or total % known != 0:
            raise ValueError(f"shape {shape} is invalid for input of size {total}")
        shape[shape.index(-1)] = total // known
    if math.prod(shape) != total:
        raise ValueError(f"shape {shape} is invalid for input of size {total}")
    return tuple(shape)


def _round_up(x, m):
    return ((x + m - 1) // m) * m


def _sublane_multiple(dtype):
    # f32 tiles as (8,128), bf16 as (16,128), int8/fp8 as (32,128).
    itemsize = jnp.dtype(dtype).itemsize
    return max(8, 32 // max(itemsize, 1))


def _is_subbyte(dtype):
    name = jnp.dtype(dtype).name
    return name in ("int4", "uint4") or "float4" in name or "e2m1" in name


def _pallas_copy_2d(x2d):
    """HBM->HBM copy of a (rows, 128) array with large pipelined blocks."""
    rows, lanes = x2d.shape
    itemsize = jnp.dtype(x2d.dtype).itemsize
    sub = _sublane_multiple(x2d.dtype)

    # ~8 MiB blocks, rounded to the packed sublane multiple.
    target_rows = max(sub, (TARGET_BLOCK_BYTES // (lanes * itemsize)) // sub * sub)
    block_rows = min(target_rows, _round_up(rows, sub))
    # Only split into >= 4 blocks (v7x megacore via the "parallel" axis) when
    # each block stays >= 2 MiB; otherwise smaller blocks are pure per-step
    # overhead for a bandwidth-bound copy (v5e/v6e have a single TensorCore).
    quarter_rows = _round_up(pl.cdiv(rows, 4), sub)
    if quarter_rows * lanes * itemsize >= MIN_SPLIT_BLOCK_BYTES:
        block_rows = min(block_rows, quarter_rows)
    block_rows = max(block_rows, sub)

    grid = (pl.cdiv(rows, block_rows),)  # partial final block is masked

    block_bytes = block_rows * lanes * itemsize
    # Double-buffered input + output = 4 live buffers; add headroom, but cap
    # well below v7x's 64 MiB physical VMEM (Mosaic needs internal scratch).
    vmem_limit = int(min(VMEM_CAP_BYTES, max(16 * 1024 * 1024, 6 * block_bytes)))

    return pl.pallas_call(
        _copy_kernel,
        out_shape=jax.ShapeDtypeStruct((rows, lanes), x2d.dtype),
        grid_spec=pltpu.PrefetchScalarGridSpec(
            num_scalar_prefetch=0,
            grid=grid,
            in_specs=[pl.BlockSpec((block_rows, lanes), lambda i: (i, 0))],
            out_specs=pl.BlockSpec((block_rows, lanes), lambda i: (i, 0)),
        ),
        compiler_params=pltpu.CompilerParams(
            dimension_semantics=("parallel",),
            vmem_limit_bytes=vmem_limit,
        ),
        cost_estimate=pl.CostEstimate(
            flops=0,
            transcendentals=0,
            bytes_accessed=2 * rows * lanes * itemsize,
        ),
    )(x2d)


def _dma_chunks(total, itemsize):
    """Static (offset, size) chunks; boundaries on 128-element multiples."""
    target_elems = max(LANES, (TARGET_BLOCK_BYTES // itemsize) // LANES * LANES)
    n = max(1, min(MAX_DMA_CHUNKS, pl.cdiv(total, target_elems)))
    base = _round_up(pl.cdiv(total, n), LANES)
    chunks = []
    off = 0
    while off < total:
        size = min(base, total - off)
        chunks.append((off, size))
        off += size
    return chunks


def _pallas_copy_dma_1d(flat):
    """HBM->HBM copy of a flat 1-D array via chunked async DMA.

    Handles sizes that are not a multiple of 128 with zero padding / slicing
    passes: all chunk offsets and sizes (including the exact ragged tail) are
    static at trace time, so they become plain DMA descriptors.
    """
    total = flat.shape[0]
    itemsize = jnp.dtype(flat.dtype).itemsize
    chunks = _dma_chunks(total, itemsize)

    def kernel(x_hbm, o_hbm, sems):
        def view(ref, off, size):
            if off == 0 and size == total:
                return ref
            return ref.at[pl.ds(off, size)]

        # Issue all chunk DMAs (lets several DMA engines run), then drain.
        for i, (off, size) in enumerate(chunks):
            pltpu.make_async_copy(view(x_hbm, off, size),
                                  view(o_hbm, off, size),
                                  sems.at[i]).start()
        for i, (off, size) in enumerate(chunks):
            pltpu.make_async_copy(view(x_hbm, off, size),
                                  view(o_hbm, off, size),
                                  sems.at[i]).wait()

    return pl.pallas_call(
        kernel,
        out_shape=jax.ShapeDtypeStruct((total,), flat.dtype),
        in_specs=[pl.BlockSpec(memory_space=pl.ANY)],
        out_specs=pl.BlockSpec(memory_space=pl.ANY),
        scratch_shapes=[pltpu.SemaphoreType.DMA((len(chunks),))],
        cost_estimate=pl.CostEstimate(
            flops=0,
            transcendentals=0,
            bytes_accessed=2 * total * itemsize,
        ),
    )(flat)


def pallas_view(x, shape, copy=True):
    """Equivalent of torch `x.view(*shape)`.

    copy=False : metadata-only (what torch.view actually does on contiguous
                 storage) -- plain jnp.reshape, no kernel, no HBM traffic.
    copy=True  : materialize the reshaped tensor with a Pallas streaming copy
                 (one HBM read + one HBM write).
    """
    total = x.size
    out_shape = _resolve_view_shape(total, shape)

    if not copy or total == 0:
        return jnp.reshape(x, out_shape)

    if _is_subbyte(x.dtype):
        # TODO(synk): 4-bit packed tiles need a layout-derived sublane multiple;
        # fall back to the metadata-only reshape for these dtypes.
        return jnp.reshape(x, out_shape)

    flat = jnp.reshape(x, (-1,))

    if total % LANES == 0:
        # Fast path (common case): lane-aligned -> big pipelined VMEM blocks.
        rows = total // LANES
        y2d = _pallas_copy_2d(flat.reshape(rows, LANES))
        return y2d.reshape(out_shape)

    # Ragged path: chunked HBM->HBM DMA, exact tail size, no pad / no slice.
    y = _pallas_copy_dma_1d(flat)
    return y.reshape(out_shape)


if __name__ == "__main__":
    key = jax.random.PRNGKey(0)
    # Module View(shape) is parameter-free; NCHW-ish input and a target shape.
    x = jax.random.normal(key, (2, 4, 16, 16), dtype=jnp.float32)

    # View((2, -1)) forward with the Pallas streaming-copy kernel.
    y = pallas_view(x, (2, -1))
    jax.block_until_ready(y)
    ref = x.reshape(2, -1)
    assert y.shape == ref.shape, (y.shape, ref.shape)
    assert y.dtype == ref.dtype
    assert bool(jnp.all(y == ref))

    # Higher-rank, -1-free target on the same data.
    y2 = pallas_view(x, (4, 2, 16, 16))
    jax.block_until_ready(y2)
    assert bool(jnp.all(y2 == x.reshape(4, 2, 16, 16)))

    # Ragged size (105 elements, not a multiple of 128): chunked-DMA path.
    xr = jax.random.normal(jax.random.PRNGKey(1), (3, 5, 7), dtype=jnp.float32)
    yr = pallas_view(xr, (-1,))
    jax.block_until_ready(yr)
    assert yr.shape == (105,)
    assert bool(jnp.all(yr == xr.reshape(-1)))

    # Metadata-only path (torch.view-faithful aliasing semantics, no kernel).
    y0 = pallas_view(x, (2, -1), copy=False)
    jax.block_until_ready(y0)
    assert bool(jnp.all(y0 == ref))

    print("KERNEL_OK")
</pallas_src>

<mosaic_0001>
module attributes {stable_mosaic.version = 11 : i64} {
  func.func @_copy_kernel(%arg0: i32, %arg1: memref<16x128xf32, #tpu.memory_space<vmem>>, %arg2: memref<16x128xf32, #tpu.memory_space<vmem>>) attributes {dimension_semantics = [#tpu.dimension_semantics<parallel>], iteration_bounds = array<i64: 1>, scalar_prefetch = 0 : i64, scratch_operands = 0 : i64, tpu.core_type = #tpu.core_type<tc>, window_params = [{transform_indices = @transform_0, window_bounds = array<i64: 16, 128>}, {transform_indices = @transform_1, window_bounds = array<i64: 16, 128>}]} {
    %c0 = arith.constant 0 : index
    %c0_0 = arith.constant 0 : index
    %0 = vector.load %arg1[%c0, %c0_0] : memref<16x128xf32, #tpu.memory_space<vmem>>, vector<16x128xf32>
    %c0_1 = arith.constant 0 : index
    %c0_2 = arith.constant 0 : index
    %1 = vector.load %arg2[%c0_1, %c0_2] : memref<16x128xf32, #tpu.memory_space<vmem>>, vector<16x128xf32>
    tpu.vector_store %arg2[%c0_1, %c0_2], %0 {strides = array<i32>} : memref<16x128xf32, #tpu.memory_space<vmem>>, vector<16x128xf32>,
    return
  }
  func.func @transform_0(%arg0: i32) -> (i32, i32) {
    %c0_i32 = arith.constant 0 : i32
    %c0_i32_0 = arith.constant 0 : i32
    return %arg0, %c0_i32 : i32, i32
  }
  func.func @transform_1(%arg0: i32) -> (i32, i32) {
    %c0_i32 = arith.constant 0 : i32
    %c0_i32_0 = arith.constant 0 : i32
    return %arg0, %c0_i32 : i32, i32
  }
}

</mosaic_0001>

<bundles_post_ra>
// kernel: tpu_custom_call.1
= control target key start
LH: loop header
LB: loop body
LE: loop exit
PB: predicated region body
PF: predicated region fallthrough
CT: control target
= control target key end

     0   :  { %6 = vsyncpa [#allocation3], 0  ;;  %s134_s0 = inlined_call_operand.hbm [shape: f32[16,128], index: 0, kind: input, shape index: {}]   ;;  %s135_s1 = inlined_call_operand.hbm [shape: f32[16,128], index: 1, kind: output, shape index: {}]  }
   0x1   :  { %7 = vsyncpa [#allocation4], 0  ;;  %s96_s6 = smov [#allocation2]   ;;  %s48_s10 = scalar_lea.hbm %s134_s0, 256 }
   0x2   :  { %s13_s7 = sshll.u32 %s96_s6, 4  ;;  %p49_p0 = scmp.ne.s32.totalorder %s134_s0, %s48_s10  ;;  %s14_s7 = int_to_ptr.vmem [resolvable:$true] %s13_s7 }
   0x3   :  { %p52_p1 = scmp.lt.u32.totalorder %s48_s10, %s134_s0 }
   0x5   :  { %p54_p2 = pnand %p52_p1, %p49_p0 }
   0x7   :  { %57 = shalt.err (!%p54_p2)
}
   0x8   :  { %s58_s15 = scalar_lea.vmem %s14_s7, 256  ;;  %p63_p4 = scmp.lt.s32.totalorder %s14_s7, %s14_s7 }
   0x9   :  { %p59_p3 = scmp.ne.s32.totalorder %s14_s7, %s58_s15  ;;  %p64_p5 = scmp.lt.s32.totalorder %s58_s15, %s58_s15 }
   0xb   :  { %p65_p6 = por %p64_p5, %p63_p4 }
   0xd   :  { %p66_p7 = pnand %p65_p6, %p59_p3 }
   0xf   :  { %69 = shalt.err (!%p66_p7)
}
  0x10   :  { %s97_s16 = smov 128   ;;  %s98_s17 = smov 8  }
  0x11   :  { %19 = dma.hbm_to_vmem [thread:$0]  %s134_s0, 256, %s14_s7, [#allocation3], %s97_s16, %s97_s16, %s98_s17  }
  0x12   :  { %92 = dma.done.wait [#allocation3], 256  }
  0x13   :  { %93 = vsyncadd [#allocation3], 4294967040  ;;  %s99_s20 = smov [#allocation5]   ;;  %v23_v0 = vld [vmem:[#allocation2] sm:$0xff]  ;;  %v24_v1 = vld [vmem:[#allocation2 + $0x8] sm:$0xff] }
  0x14   :  { %s32_s21 = sshll.u32 %s99_s20, 4  ;;  %25 = vst [vmem:[#allocation5] sm:$0xff] %v23_v0  ;;  %26 = vst [vmem:[#allocation5 + $0x8] sm:$0xff] %v24_v1  ;;  %s33_s21 = int_to_ptr.vmem [resolvable:$true] %s32_s21 }
  0x15   :  { %s70_s22 = scalar_lea.vmem %s33_s21, 256  ;;  %p75_p9 = scmp.lt.s32.totalorder %s33_s21, %s33_s21 }
  0x16   :  { %p71_p8 = scmp.ne.s32.totalorder %s33_s21, %s70_s22  ;;  %p76_p10 = scmp.lt.s32.totalorder %s70_s22, %s70_s22 }
  0x18   :  { %p77_p11 = por %p76_p10, %p75_p9 }
  0x1a   :  { %p78_p12 = pnand %p77_p11, %p71_p8 }
  0x1c   :  { %81 = shalt.err (!%p78_p12)
}
  0x1d   :  { %s82_s0 = scalar_lea.hbm %s135_s1, 256 }
  0x1e   :  { %p83_p13 = scmp.ne.s32.totalorder %s135_s1, %s82_s0  ;;  %p86_p0 = scmp.lt.u32.totalorder %s82_s0, %s135_s1 }
  0x20   :  { %p88_p1 = pnand %p86_p0, %p83_p13 }
  0x22   :  { %91 = shalt.err (!%p88_p1)
}
  0x23   :  { %38 = dma.vmem_to_hbm [thread:$0]  %s33_s21, 256, %s135_s1, [#allocation4], %s97_s16, %s97_s16, %s98_s17  }
  0x24   :  { %94 = dma.done.wait [#allocation4], 256  }
  0x25   :  { %95 = vsyncadd [#allocation4], 4294967040 }
  0x26   :  { %42 = vsyncpa [#allocation3], 1 }
  0x27   :  { %43 = vsyncpa [#allocation4], 1 }

</bundles_post_ra>
